<compile_context>
chip_gen: v5e
topology: v5e:2x2
jax: 0.10.0
libtpu: 0.0.40
codegen_flags: <defaults>
</compile_context>

<pallas_src>
import jax
import jax.numpy as jnp
from jax.experimental import pallas as pl
from jax.experimental.pallas import tpu as pltpu

HIDDEN = 256


def _round_up(n, m):
    return ((n + m - 1) // m) * m


def generator_kernel(x_ref, w1_ref, b1_ref, w2_ref, b2_ref, o_ref):
    # Layer 1: (TM, z_dim) @ (z_dim, 256) on MXU, bf16 operands, f32 accumulate.
    h = jnp.dot(x_ref[...], w1_ref[...], preferred_element_type=jnp.float32)
    h = h + b1_ref[...]                      # (1, 256) f32 row broadcast
    h = jnp.maximum(h, 0.1 * h)              # LeakyReLU(0.1), 1 VPU max per vreg
    # Layer 2: (TM, 256) @ (256, img_dim_p); bf16 operands, f32 accumulate.
    y = jnp.dot(h.astype(jnp.bfloat16), w2_ref[...],
                preferred_element_type=jnp.float32)
    y = y + b2_ref[...]                      # (1, img_dim_p) f32 row broadcast
    o_ref[...] = jnp.tanh(y).astype(o_ref.dtype)   # tanh -> EUP


def generator_forward(x, w1, b1, w2, b2, *, block_m=256):
    """Generator forward pass.

    x : (B, z_dim) f32
    w1: (z_dim, 256)    b1: (256,)        (weights stored as (in, out) == W.T)
    w2: (256, img_dim)  b2: (img_dim,)
    returns (B, img_dim) f32
    """
    B, z_dim = x.shape
    hidden = w1.shape[1]
    img_dim = w2.shape[1]

    # Lane-dense output: pad img_dim up to a multiple of 128.
    img_p = _round_up(img_dim, 128)
    # Batch tile: multiple of 8 sublanes, capped so tiles stay tiny in VMEM.
    tm = min(block_m, _round_up(B, 8))
    b_p = _round_up(B, tm)

    # Wrapper-side padding / casting (layout plumbing, not compute hoisting).
    x_p = jnp.zeros((b_p, z_dim), jnp.bfloat16).at[:B].set(x.astype(jnp.bfloat16))
    w1_c = w1.astype(jnp.bfloat16)
    b1_c = b1.reshape(1, hidden).astype(jnp.float32)
    w2_p = jnp.zeros((hidden, img_p), jnp.bfloat16).at[:, :img_dim].set(
        w2.astype(jnp.bfloat16))
    b2_p = jnp.zeros((1, img_p), jnp.float32).at[:, :img_dim].set(
        b2.reshape(1, img_dim).astype(jnp.float32))

    out = pl.pallas_call(
        generator_kernel,
        out_shape=jax.ShapeDtypeStruct((b_p, img_p), jnp.float32),
        grid_spec=pltpu.PrefetchScalarGridSpec(
            num_scalar_prefetch=0,
            grid=(b_p // tm,),
            in_specs=[
                pl.BlockSpec((tm, z_dim), lambda i: (i, 0)),       # x tile streams
                pl.BlockSpec((z_dim, hidden), lambda i: (0, 0)),   # w1 resident
                pl.BlockSpec((1, hidden), lambda i: (0, 0)),       # b1 resident
                pl.BlockSpec((hidden, img_p), lambda i: (0, 0)),   # w2 resident
                pl.BlockSpec((1, img_p), lambda i: (0, 0)),        # b2 resident
            ],
            out_specs=pl.BlockSpec((tm, img_p), lambda i: (i, 0)),
        ),
        compiler_params=pltpu.CompilerParams(
            dimension_semantics=("parallel",),   # lets v7x split batch over 2 TCs
        ),
    )(x_p, w1_c, b1_c, w2_p, b2_p)
    return out[:B, :img_dim]


def init_generator_params(key, z_dim, img_dim, hidden=HIDDEN):
    """PyTorch nn.Linear-style init, weights pre-transposed to (in, out)."""
    k1, k2, k3, k4 = jax.random.split(key, 4)
    bound1 = 1.0 / (z_dim ** 0.5)
    w1 = jax.random.uniform(k1, (z_dim, hidden), jnp.float32, -bound1, bound1)
    b1 = jax.random.uniform(k2, (hidden,), jnp.float32, -bound1, bound1)
    bound2 = 1.0 / (hidden ** 0.5)
    w2 = jax.random.uniform(k3, (hidden, img_dim), jnp.float32, -bound2, bound2)
    b2 = jax.random.uniform(k4, (img_dim,), jnp.float32, -bound2, bound2)
    return w1, b1, w2, b2


def reference_forward(x, w1, b1, w2, b2):
    h = x @ w1 + b1[None, :]
    h = jnp.where(h > 0, h, 0.1 * h)
    return jnp.tanh(h @ w2 + b2[None, :])


if __name__ == "__main__":
    # Small shapes consistent with the module: noise vector -> flattened image.
    batch = 4
    z_dim = 32
    img_dim = 64   # e.g. an 8x8 "image", flattened

    key = jax.random.PRNGKey(0)
    k_params, k_x = jax.random.split(key)
    w1, b1, w2, b2 = init_generator_params(k_params, z_dim, img_dim)
    x = jax.random.normal(k_x, (batch, z_dim), jnp.float32)

    # Pre-quantize weights/inputs to bf16-representable f32 so the f32 reference
    # uses exactly the values the kernel sees (kernel uses bf16 MXU operands).
    w1 = w1.astype(jnp.bfloat16).astype(jnp.float32)
    w2 = w2.astype(jnp.bfloat16).astype(jnp.float32)
    x = x.astype(jnp.bfloat16).astype(jnp.float32)

    out = generator_forward(x, w1, b1, w2, b2)
    out = jax.block_until_ready(out)

    ref = reference_forward(x, w1, b1, w2, b2)
    assert out.shape == (batch, img_dim)
    assert jnp.allclose(out, ref, atol=2e-2, rtol=2e-2), "mismatch vs reference"

    print("KERNEL_OK")
</pallas_src>

<mosaic_0001>
module attributes {stable_mosaic.version = 11 : i64} {
  func.func @generator_kernel(%arg0: i32, %arg1: memref<8x32xbf16, #tpu.memory_space<vmem>>, %arg2: memref<32x256xbf16, #tpu.memory_space<vmem>>, %arg3: memref<1x256xf32, #tpu.memory_space<vmem>>, %arg4: memref<256x128xbf16, #tpu.memory_space<vmem>>, %arg5: memref<1x128xf32, #tpu.memory_space<vmem>>, %arg6: memref<8x128xf32, #tpu.memory_space<vmem>>) attributes {dimension_semantics = [#tpu.dimension_semantics<parallel>], iteration_bounds = array<i64: 1>, scalar_prefetch = 0 : i64, scratch_operands = 0 : i64, tpu.core_type = #tpu.core_type<tc>, window_params = [{transform_indices = @transform_0, window_bounds = array<i64: 8, 32>}, {pipeline_mode = #tpu.pipeline_mode<synchronous>, transform_indices = @transform_1, window_bounds = array<i64: 32, 256>}, {pipeline_mode = #tpu.pipeline_mode<synchronous>, transform_indices = @transform_2, window_bounds = array<i64: 1, 256>}, {pipeline_mode = #tpu.pipeline_mode<synchronous>, transform_indices = @transform_3, window_bounds = array<i64: 256, 128>}, {pipeline_mode = #tpu.pipeline_mode<synchronous>, transform_indices = @transform_4, window_bounds = array<i64: 1, 128>}, {transform_indices = @transform_5, window_bounds = array<i64: 8, 128>}]} {
    %c0 = arith.constant 0 : index
    %c0_0 = arith.constant 0 : index
    %0 = vector.load %arg1[%c0, %c0_0] : memref<8x32xbf16, #tpu.memory_space<vmem>>, vector<8x32xbf16>
    %c0_1 = arith.constant 0 : index
    %c0_2 = arith.constant 0 : index
    %1 = vector.load %arg2[%c0_1, %c0_2] : memref<32x256xbf16, #tpu.memory_space<vmem>>, vector<32x256xbf16>
    %cst = arith.constant dense<0.000000e+00> : vector<8x256xf32>
    %2 = tpu.matmul %0, %1, %cst {dimension_numbers = #tpu.dot_dimension_numbers<[1], [0], [0], [1], [0, 0, 1, 1], [], []>} : vector<8x32xbf16>, vector<32x256xbf16>, vector<8x256xf32> -> vector<8x256xf32>
    %c0_3 = arith.constant 0 : index
    %c0_4 = arith.constant 0 : index
    %3 = vector.load %arg3[%c0_3, %c0_4] : memref<1x256xf32, #tpu.memory_space<vmem>>, vector<1x256xf32>
    %4 = vector.broadcast %3 : vector<1x256xf32> to vector<8x256xf32>
    %5 = arith.addf %2, %4 : vector<8x256xf32>
    %cst_5 = arith.constant 1.000000e-01 : f32
    %6 = vector.broadcast %cst_5 : f32 to vector<8x256xf32>
    %7 = arith.mulf %6, %5 : vector<8x256xf32>
    %8 = arith.maximumf %5, %7 : vector<8x256xf32>
    %9 = arith.truncf %8 : vector<8x256xf32> to vector<8x256xbf16>
    %c0_6 = arith.constant 0 : index
    %c0_7 = arith.constant 0 : index
    %10 = vector.load %arg4[%c0_6, %c0_7] : memref<256x128xbf16, #tpu.memory_space<vmem>>, vector<256x128xbf16>
    %cst_8 = arith.constant dense<0.000000e+00> : vector<8x128xf32>
    %11 = tpu.matmul %9, %10, %cst_8 {dimension_numbers = #tpu.dot_dimension_numbers<[1], [0], [0], [1], [0, 0, 1, 1], [], []>} : vector<8x256xbf16>, vector<256x128xbf16>, vector<8x128xf32> -> vector<8x128xf32>
    %c0_9 = arith.constant 0 : index
    %c0_10 = arith.constant 0 : index
    %12 = vector.load %arg5[%c0_9, %c0_10] : memref<1x128xf32, #tpu.memory_space<vmem>>, vector<1x128xf32>
    %13 = vector.broadcast %12 : vector<1x128xf32> to vector<8x128xf32>
    %14 = arith.addf %11, %13 : vector<8x128xf32>
    %15 = math.tanh %14 : vector<8x128xf32>
    %c0_11 = arith.constant 0 : index
    %c0_12 = arith.constant 0 : index
    %16 = vector.load %arg6[%c0_11, %c0_12] : memref<8x128xf32, #tpu.memory_space<vmem>>, vector<8x128xf32>
    tpu.vector_store %arg6[%c0_11, %c0_12], %15 {strides = array<i32>} : memref<8x128xf32, #tpu.memory_space<vmem>>, vector<8x128xf32>,
    return
  }
  func.func @transform_0(%arg0: i32) -> (i32, i32) {
    %c0_i32 = arith.constant 0 : i32
    %c0_i32_0 = arith.constant 0 : i32
    return %arg0, %c0_i32 : i32, i32
  }
  func.func @transform_1(%arg0: i32) -> (i32, i32) {
    %c0_i32 = arith.constant 0 : i32
    %c0_i32_0 = arith.constant 0 : i32
    %c0_i32_1 = arith.constant 0 : i32
    return %c0_i32, %c0_i32_0 : i32, i32
  }
  func.func @transform_2(%arg0: i32) -> (i32, i32) {
    %c0_i32 = arith.constant 0 : i32
    %c0_i32_0 = arith.constant 0 : i32
    %c0_i32_1 = arith.constant 0 : i32
    return %c0_i32, %c0_i32_0 : i32, i32
  }
  func.func @transform_3(%arg0: i32) -> (i32, i32) {
    %c0_i32 = arith.constant 0 : i32
    %c0_i32_0 = arith.constant 0 : i32
    %c0_i32_1 = arith.constant 0 : i32
    return %c0_i32, %c0_i32_0 : i32, i32
  }
  func.func @transform_4(%arg0: i32) -> (i32, i32) {
    %c0_i32 = arith.constant 0 : i32
    %c0_i32_0 = arith.constant 0 : i32
    %c0_i32_1 = arith.constant 0 : i32
    return %c0_i32, %c0_i32_0 : i32, i32
  }
  func.func @transform_5(%arg0: i32) -> (i32, i32) {
    %c0_i32 = arith.constant 0 : i32
    %c0_i32_0 = arith.constant 0 : i32
    return %arg0, %c0_i32 : i32, i32
  }
}

</mosaic_0001>

<bundles_post_ra>
// kernel: tpu_custom_call.1
= control target key start
LH: loop header
LB: loop body
LE: loop exit
PB: predicated region body
PF: predicated region fallthrough
CT: control target
= control target key end

     0   :  { %10 = vsyncpa [#allocation3], 0  ;;  %s626_s0 = inlined_call_operand.hbm [shape: bf16[8,32], index: 0, kind: input, shape index: {}]   ;;  %s627_s1 = inlined_call_operand.hbm [shape: bf16[32,256], index: 1, kind: input, shape index: {}]   ;;  %s628_s2 = inlined_call_operand.hbm [shape: f32[1,256], index: 2, kind: input, shape index: {}]   ;;  %s629_s3 = inlined_call_operand.hbm [shape: bf16[256,128], index: 3, kind: input, shape index: {}]   ;;  %s630_s4 = inlined_call_operand.vmem [shape: f32[1,128], index: 4, kind: input, shape index: {}]   ;;  %s631_s5 = inlined_call_operand.hbm [shape: f32[8,128], index: 5, kind: output, shape index: {}]  }
   0x1   :  { %11 = vsyncpa [#allocation6], 0 }
   0x2   :  { %12 = vsyncpa [#allocation9], 0  ;;  %s29_s20 = sshll.u32 %s627_s1, 4  ;;  %s30_s20 = int_to_ptr.hbm [resolvable:$true] %s29_s20 }
   0x3   :  { %13 = vsyncpa [#allocation4], 0  ;;  %s569_s21 = smov [#allocation5]   ;;  %s19_s25 = sshll.u32 %s626_s0, 4  ;;  %s20_s25 = int_to_ptr.hbm [resolvable:$true] %s19_s25 }
   0x4   :  { %s31_s22 = sshll.u32 %s569_s21, 4  ;;  %s570_s26 = smov 128   ;;  %s32_s22 = int_to_ptr.vmem [resolvable:$true] %s31_s22 }
   0x5   :  { %s571_s27 = smov 8   ;;  %s572_s28 = smov [#allocation2]  }
   0x6   :  { %37 = dma.hbm_to_vmem [thread:$0]  %s30_s20, 512, %s32_s22, [#allocation6], %s570_s26, %s570_s26, %s571_s27  }
   0x7   :  { %s21_s29 = sshll.u32 %s572_s28, 4  ;;  %s43_s7 = sshll.u32 %s628_s2, 4  ;;  %s22_s29 = int_to_ptr.vmem [resolvable:$true] %s21_s29  ;;  %s44_s7 = int_to_ptr.hbm [resolvable:$true] %s43_s7 }
   0x8   :  { %24 = dma.hbm_to_vmem [thread:$0]  %s20_s25, 64, %s22_s29, [#allocation3]  }
   0x9   :  { %s53_s9 = sshll.u32 %s629_s3, 4  ;;  %s573_s10 = smov [#allocation7]   ;;  %s54_s9 = int_to_ptr.hbm [resolvable:$true] %s53_s9 }
   0xa   :  { %s45_s11 = sshll.u32 %s573_s10, 4  ;;  %s574_s0 = smov [#allocation8]   ;;  %s46_s11 = int_to_ptr.vmem [resolvable:$true] %s45_s11 }
   0xb   :  { %48 = dma.hbm_to_vmem [thread:$0]  %s44_s7, 32, %s46_s11, [#allocation6]  }
   0xc   :  { %s55_s12 = sshll.u32 %s574_s0, 4  ;;  %s575_s13 = smov 64   ;;  %s56_s12 = int_to_ptr.vmem [resolvable:$true] %s55_s12 }
   0xd   :  { %s576_s14 = smov 4  }
   0xe   :  { %61 = dma.hbm_to_vmem [thread:$0]  %s54_s9, 2048, %s56_s12, [#allocation9], %s575_s13, %s575_s13, %s576_s14  }
   0xf   :  { %561 = dma.done.wait [#allocation3], 64  }
  0x10   :  { %562 = vsyncadd [#allocation3], 4294967232 }
  0x11   :  { %563 = dma.done.wait [#allocation6], 544  }
  0x12   :  { %564 = vsyncadd [#allocation6], 4294966752 }
  0x13   :  { %565 = dma.done.wait [#allocation9], 2048  }
  0x14   :  { %566 = vsyncadd [#allocation9], 4294965248  ;;  %v337_v0 = vld [vmem:[#allocation5 + $0x10] sm:$0xf]  ;;  %v412_v1 = vld [vmem:[#allocation5 + $0x14] sm:$0xf0] }
  0x15   :  { %v411_v2 = vld [vmem:[#allocation5 + $0x14] sm:$0xf]  ;;  %v338_v3 = vor.u32 %v412_v1, %v337_v0  ;;  %v339_v4 = vld [vmem:[#allocation5 + $0x18] sm:$0xf0]  ;;  %v329_v5 = vld [vmem:[#allocation5] sm:$0xf] }
  0x16   :  { %v410_v6 = vld [vmem:[#allocation5 + $0x4] sm:$0xf0]  ;;  %v342_v7 = vor.u32 %v411_v2, %v339_v4  ;;  %v409_v8 = vld [vmem:[#allocation5 + $0x4] sm:$0xf]  ;;  %v331_v9 = vld [vmem:[#allocation5 + $0x8] sm:$0xf0] }
  0x17   :  { %122 = vmatpush.bf16.msra.mxu0 %v338_v3  ;;  %v330_v10 = vor.u32 %v410_v6, %v329_v5  ;;  %v420_v11 = vld [vmem:[#allocation8 + $0x38] sm:$0xff]  ;;  %v334_v13 = vor.u32 %v409_v8, %v331_v9  ;;  %v419_v14 = vld [vmem:[#allocation8 + $0x30] sm:$0xff]  ;;  %vm112_vm0 = vcmask 261120   ;;  %v418_v17 = vld [vmem:[#allocation8 + $0x28] sm:$0xff]  ;;  %s577_s15 = smov [#allocation10]   ;;  %s315_s19 = sshll.u32 %s631_s5, 4  ;;  %s316_s19 = int_to_ptr.hbm [resolvable:$true] %s315_s19 }
  0x18   :  { %v428_v12 = vld [vmem:[#allocation8 + $0x78] sm:$0xff]  ;;  %135 = vmatpush.bf16.msra.mxu1 %v342_v7  ;;  %280 = vmatpush.bf16.msra.mxu2 %v420_v11  ;;  %v427_v15 = vld [vmem:[#allocation8 + $0x70] sm:$0xff]  ;;  %v426_v18 = vld [vmem:[#allocation8 + $0x68] sm:$0xff]  ;;  %s313_s16 = sshll.u32 %s577_s15, 4  ;;  %s314_s16 = int_to_ptr.vmem [resolvable:$true] %s313_s16 }
  0x19   :  { %293 = vmatpush.bf16.msra.mxu3 %v428_v12  ;;  %v81_v16 = vld [vmem:[#allocation2] sm:$0xf]  ;;  %v417_v19 = vld [vmem:[#allocation8 + $0x20] sm:$0xff]  ;;  %v415_v23 = vld [vmem:[#allocation8 + $0x10] sm:$0xff] }
  0x1a   :  { %v425_v20 = vld [vmem:[#allocation8 + $0x60] sm:$0xff]  ;;  %v416_v21 = vld [vmem:[#allocation8 + $0x18] sm:$0xff]  ;;  %v423_v24 = vld [vmem:[#allocation8 + $0x50] sm:$0xff] }
  0x1b   :  { %123 = vmatpush.bf16.msra.mxu0 %v330_v10  ;;  %v424_v22 = vld [vmem:[#allocation8 + $0x58] sm:$0xff]  ;;  %v414_v25 = vld [vmem:[#allocation8 + $0x8] sm:$0xff]  ;;  %v413_v27 = vld [vmem:[#allocation8] sm:$0xff] }
  0x1c   :  { %136 = vmatpush.bf16.msra.mxu1 %v334_v13  ;;  %281 = vmatpush.bf16.msra.mxu2 %v419_v14  ;;  %v422_v26 = vld [vmem:[#allocation8 + $0x48] sm:$0xff]  ;;  %v421_v28 = vld [vmem:[#allocation8 + $0x40] sm:$0xff]  ;;  %v86_v29 = vld [vmem:[#allocation7] sm:$0x3] }
  0x1d   :  { %294 = vmatpush.bf16.msra.mxu3 %v427_v15  ;;  %v88_v30 = vperm.slane %v86_v29, 0  ;;  %v89_v31 = vperm.slane %v86_v29, 1  ;;  %v438_v44 = vld [vmem:[%s630_s4] ss:$0 sm:$0xff] }
  0x1e   :  { %343 = vmatmul.msk.bf16.vlgmr.msra.gmra.mxu0 %vm112_vm0, %v81_v16 }
  0x1f   :  { %344 = vmatmul.msk.bf16.vlgmr.msra.gmra.mxu1 %vm112_vm0, %v81_v16 }
  0x20   :  { %282 = vmatpush.bf16.msra.mxu2 %v418_v17 }
  0x21   :  { %295 = vmatpush.bf16.msra.mxu3 %v426_v18 }
  0x24   :  { %283 = vmatpush.bf16.msra.mxu2 %v417_v19 }
  0x25   :  { %296 = vmatpush.bf16.msra.mxu3 %v425_v20 }
  0x28   :  { %284 = vmatpush.bf16.msra.mxu2 %v416_v21 }
  0x29   :  { %297 = vmatpush.bf16.msra.mxu3 %v424_v22 }
  0x2c   :  { %285 = vmatpush.bf16.msra.mxu2 %v415_v23 }
  0x2d   :  { %298 = vmatpush.bf16.msra.mxu3 %v423_v24 }
  0x30   :  { %286 = vmatpush.bf16.msra.mxu2 %v414_v25 }
  0x31   :  { %299 = vmatpush.bf16.msra.mxu3 %v422_v26 }
  0x34   :  { %287 = vmatpush.bf16.msra.mxu2 %v413_v27 }
  0x35   :  { %300 = vmatpush.bf16.msra.mxu3 %v421_v28 }
  0x9b   :  { %v125_v32 = vpop.f32.mrf.mxu0 }
  0x9c   :  { %v126_v33 = vadd.f32 %v125_v32, %v88_v30  ;;  %v138_v34 = vpop.f32.mrf.mxu1 }
  0x9d   :  { %v139_v35 = vadd.f32 %v138_v34, %v89_v31 }
  0x9e   :  { %v142_v36 = vmul.f32 0.1, %v126_v33 }
  0x9f   :  { %v143_v37 = vmul.f32 0.1, %v139_v35 }
  0xa0   :  { %v144_v38 = vmax.f32 %v126_v33, %v142_v36 }
  0xa1   :  { %v145_v39 = vmax.f32 %v139_v35, %v143_v37 }
  0xa2   :  { %v146_v40 = vpack.c.bf16 %v144_v38, %v144_v38 }
  0xa3   :  { %v127_v41 = vpop.f32.mrf.mxu0  ;;  %v147_v42 = vpack.c.bf16 %v145_v39, %v145_v39 }
  0xa4   :  { %v140_v43 = vpop.f32.mrf.mxu1  ;;  %288 = vmatmul.bf16.vlgmr.msra.gmra.mxu2 %v146_v40 }
  0xa5   :  { %301 = vmatmul.bf16.vlgmr.msra.gmra.mxu3 %v147_v42 }
 0x127   :  { %v289_v45 = vpop.f32.mrf.mxu2 }
 0x128   :  { %v290_v46 = vadd.f32 %v438_v44, %v289_v45  ;;  %v302_v47 = vpop.f32.mrf.mxu3 }
 0x12a   :  { %v303_v48 = vadd.f32 %v302_v47, %v290_v46 }
 0x12c   :  { %439 = vtanh.f32 %v303_v48 }
 0x12f   :  { %v291_v49 = vpop.f32.mrf.mxu2 }
 0x130   :  { %v304_v50 = vpop.f32.mrf.mxu3 }
 0x132   :  { %v440_v51 = vpop.eup %439 }
 0x133   :  { %307 = vst [vmem:[#allocation10] sm:$0xff] %v440_v51 }
 0x134   :  { %318 = dma.vmem_to_hbm [thread:$0]  %s314_s16, 128, %s316_s19, [#allocation4]  }
 0x135   :  { %567 = dma.done.wait [#allocation4], 128  }
 0x136   :  { %568 = vsyncadd [#allocation4], 4294967168 }
 0x137   :  { %323 = vsyncpa [#allocation3], 1 }
 0x138   :  { %324 = vsyncpa [#allocation6], 1 }
 0x139   :  { %325 = vsyncpa [#allocation9], 1 }
 0x13a   :  { %326 = vsyncpa [#allocation4], 1 }

</bundles_post_ra>
